<compile_context>
chip_gen: v7x
topology: tpu7x:2x2x1
jax: 0.10.0
libtpu: 0.0.40
codegen_flags: <defaults>
</compile_context>

<pallas_src>
import jax
import jax.numpy as jnp
from jax.experimental import pallas as pl
from jax.experimental.pallas import tpu as pltpu


def _fused_head_kernel(x1_ref, x2_ref, x3_ref,
                       w1_ref, w2_ref, w3_ref, b_ref,
                       y_ref):
    # Split-weight matmul: equivalent to concat([x1,x2,x3],1) @ w_cat but with
    # zero concat / XLU work.  All accumulation in f32 on the MXU.
    acc = jnp.dot(x1_ref[...], w1_ref[...], preferred_element_type=jnp.float32)
    acc = acc + jnp.dot(x2_ref[...], w2_ref[...],
                        preferred_element_type=jnp.float32)
    acc = acc + jnp.dot(x3_ref[...], w3_ref[...],
                        preferred_element_type=jnp.float32)
    # Single fused bias (1, n_out+n_aux), broadcast over the batch rows.
    y_ref[...] = (acc + b_ref[...]).astype(y_ref.dtype)


def concat_head(x1, x2, x3, w, b, w_aux, b_aux, *, block_b=256):
    """Pallas implementation of Concat.forward (ethogram + aux heads).

    Returns [out (B, n_out), aux (B, n_aux)].
    """
    B = x1.shape[0]
    d1, d2, d3 = x1.shape[1], x2.shape[1], x3.shape[1]
    D = d1 + d2 + d3
    n_out = w.shape[1]
    n_aux = w_aux.shape[1]
    n_tot = n_out + n_aux

    # Fuse the two heads into one weight/bias (parameter-side ops, hoisted by
    # XLA under jit), and pre-split the weight rows per input so the kernel
    # never concatenates activations.
    w_cat = jnp.concatenate([w, w_aux], axis=1)                    # (D, n_tot)
    b_cat = jnp.concatenate([jnp.reshape(b, (1, n_out)),
                             jnp.reshape(b_aux, (1, n_aux))], axis=1)  # (1, n_tot)
    w1 = w_cat[:d1]
    w2 = w_cat[d1:d1 + d2]
    w3 = w_cat[d1 + d2:]

    cost = pl.CostEstimate(
        flops=2 * B * D * n_tot,
        transcendentals=0,
        bytes_accessed=4 * (B * D + D * n_tot + n_tot + B * n_tot),
    )
    out_shape = jax.ShapeDtypeStruct((B, n_tot), x1.dtype)

    if B <= block_b:
        # Tiny, overhead-bound case: no grid, single invocation, whole arrays
        # resident in VMEM (default specs), one lane-narrow store.
        y = pl.pallas_call(
            _fused_head_kernel,
            out_shape=out_shape,
            cost_estimate=cost,
        )(x1, x2, x3, w1, w2, w3, b_cat)
    else:
        # Larger batch: tile over B and mark the axis parallel so megacore
        # (v7x: 2 TCs) splits the batch; per-step VMEM stays small.
        nb = pl.cdiv(B, block_b)
        y = pl.pallas_call(
            _fused_head_kernel,
            grid=(nb,),
            in_specs=[
                pl.BlockSpec((block_b, d1), lambda i: (i, 0)),
                pl.BlockSpec((block_b, d2), lambda i: (i, 0)),
                pl.BlockSpec((block_b, d3), lambda i: (i, 0)),
                pl.BlockSpec((d1, n_tot), lambda i: (0, 0)),
                pl.BlockSpec((d2, n_tot), lambda i: (0, 0)),
                pl.BlockSpec((d3, n_tot), lambda i: (0, 0)),
                pl.BlockSpec((1, n_tot), lambda i: (0, 0)),
            ],
            out_specs=pl.BlockSpec((block_b, n_tot), lambda i: (i, 0)),
            out_shape=out_shape,
            compiler_params=pltpu.CompilerParams(
                dimension_semantics=("parallel",)),
            cost_estimate=cost,
        )(x1, x2, x3, w1, w2, w3, b_cat)

    # Split the fused output back into [main, aux] (tiny wrapper-side slices).
    return [y[:, :n_out], y[:, n_out:]]


def _reference(x1, x2, x3, w, b, w_aux, b_aux):
    x = jnp.concatenate([x1, x2, x3], axis=1)
    return [x @ w + jnp.reshape(b, (1, -1)),
            x @ w_aux + jnp.reshape(b_aux, (1, -1))]


def _check(B, dim1, dim2, dim3, seed, block_b=256):
    key = jax.random.PRNGKey(seed)
    k1, k2, k3, kw, kb, kwa, kba = jax.random.split(key, 7)
    D = dim1 + dim2 + dim3
    out_units = 1      # DATA_TYPE='simple'
    aux_units = 3      # REQUIRE_AUX=True

    x1 = jax.random.normal(k1, (B, dim1), dtype=jnp.float32)
    x2 = jax.random.normal(k2, (B, dim2), dtype=jnp.float32)
    x3 = jax.random.normal(k3, (B, dim3), dtype=jnp.float32)

    # nn.Linear-style init; biases use PyTorch's (out_features,) shape.
    lim = 1.0 / jnp.sqrt(jnp.float32(D))
    w = jax.random.uniform(kw, (D, out_units), jnp.float32, -lim, lim)
    b = jax.random.uniform(kb, (out_units,), jnp.float32, -lim, lim)
    w_aux = jax.random.uniform(kwa, (D, aux_units), jnp.float32, -lim, lim)
    b_aux = jax.random.uniform(kba, (aux_units,), jnp.float32, -lim, lim)

    out, aux = concat_head(x1, x2, x3, w, b, w_aux, b_aux, block_b=block_b)
    jax.block_until_ready(out)
    jax.block_until_ready(aux)

    ref_out, ref_aux = _reference(x1, x2, x3, w, b, w_aux, b_aux)
    assert out.shape == ref_out.shape and aux.shape == ref_aux.shape
    assert jnp.allclose(out, ref_out, atol=2e-5, rtol=1e-5)
    assert jnp.allclose(aux, ref_aux, atol=2e-5, rtol=1e-5)


if __name__ == "__main__":
    # Small, forward-consistent shapes (no-grid path).
    _check(B=8, dim1=32, dim2=32, dim3=64, seed=0)
    # Moderately larger batch exercises the batch-tiled ("parallel") path.
    _check(B=512, dim1=32, dim2=32, dim3=64, seed=1, block_b=256)
    print("KERNEL_OK")
</pallas_src>

<mosaic_0001>
module attributes {stable_mosaic.version = 11 : i64} {
  func.func @_fused_head_kernel(%arg0: memref<8x32xf32, #tpu.memory_space<vmem>>, %arg1: memref<8x32xf32, #tpu.memory_space<vmem>>, %arg2: memref<8x64xf32, #tpu.memory_space<vmem>>, %arg3: memref<32x4xf32, #tpu.memory_space<vmem>>, %arg4: memref<32x4xf32, #tpu.memory_space<vmem>>, %arg5: memref<64x4xf32, #tpu.memory_space<vmem>>, %arg6: memref<1x4xf32, #tpu.memory_space<vmem>>, %arg7: memref<8x4xf32, #tpu.memory_space<vmem>>) attributes {dimension_semantics = [], scalar_prefetch = 0 : i64, scratch_operands = 0 : i64, tpu.core_type = #tpu.core_type<tc>} {
    %c0 = arith.constant 0 : index
    %c0_0 = arith.constant 0 : index
    %0 = vector.load %arg0[%c0, %c0_0] : memref<8x32xf32, #tpu.memory_space<vmem>>, vector<8x32xf32>
    %c0_1 = arith.constant 0 : index
    %c0_2 = arith.constant 0 : index
    %1 = vector.load %arg3[%c0_1, %c0_2] : memref<32x4xf32, #tpu.memory_space<vmem>>, vector<32x4xf32>
    %cst = arith.constant dense<0.000000e+00> : vector<8x4xf32>
    %2 = tpu.matmul %0, %1, %cst {dimension_numbers = #tpu.dot_dimension_numbers<[1], [0], [0], [1], [0, 0, 1, 1], [], []>} : vector<8x32xf32>, vector<32x4xf32>, vector<8x4xf32> -> vector<8x4xf32>
    %c0_3 = arith.constant 0 : index
    %c0_4 = arith.constant 0 : index
    %3 = vector.load %arg1[%c0_3, %c0_4] : memref<8x32xf32, #tpu.memory_space<vmem>>, vector<8x32xf32>
    %c0_5 = arith.constant 0 : index
    %c0_6 = arith.constant 0 : index
    %4 = vector.load %arg4[%c0_5, %c0_6] : memref<32x4xf32, #tpu.memory_space<vmem>>, vector<32x4xf32>
    %cst_7 = arith.constant dense<0.000000e+00> : vector<8x4xf32>
    %5 = tpu.matmul %3, %4, %cst_7 {dimension_numbers = #tpu.dot_dimension_numbers<[1], [0], [0], [1], [0, 0, 1, 1], [], []>} : vector<8x32xf32>, vector<32x4xf32>, vector<8x4xf32> -> vector<8x4xf32>
    %6 = arith.addf %2, %5 : vector<8x4xf32>
    %c0_8 = arith.constant 0 : index
    %c0_9 = arith.constant 0 : index
    %7 = vector.load %arg2[%c0_8, %c0_9] : memref<8x64xf32, #tpu.memory_space<vmem>>, vector<8x64xf32>
    %c0_10 = arith.constant 0 : index
    %c0_11 = arith.constant 0 : index
    %8 = vector.load %arg5[%c0_10, %c0_11] : memref<64x4xf32, #tpu.memory_space<vmem>>, vector<64x4xf32>
    %cst_12 = arith.constant dense<0.000000e+00> : vector<8x4xf32>
    %9 = tpu.matmul %7, %8, %cst_12 {dimension_numbers = #tpu.dot_dimension_numbers<[1], [0], [0], [1], [0, 0, 1, 1], [], []>} : vector<8x64xf32>, vector<64x4xf32>, vector<8x4xf32> -> vector<8x4xf32>
    %10 = arith.addf %6, %9 : vector<8x4xf32>
    %c0_13 = arith.constant 0 : index
    %c0_14 = arith.constant 0 : index
    %11 = vector.load %arg6[%c0_13, %c0_14] : memref<1x4xf32, #tpu.memory_space<vmem>>, vector<1x4xf32>
    %12 = vector.broadcast %11 : vector<1x4xf32> to vector<8x4xf32>
    %13 = arith.addf %10, %12 : vector<8x4xf32>
    %c0_15 = arith.constant 0 : index
    %c0_16 = arith.constant 0 : index
    %14 = vector.load %arg7[%c0_15, %c0_16] : memref<8x4xf32, #tpu.memory_space<vmem>>, vector<8x4xf32>
    tpu.vector_store %arg7[%c0_15, %c0_16], %13 {strides = array<i32>} : memref<8x4xf32, #tpu.memory_space<vmem>>, vector<8x4xf32>,
    return
  }
}

</mosaic_0001>

<bundles_post_ra>
// kernel: tpu_custom_call.1
= control target key start
LH: loop header
LB: loop body
LE: loop exit
PB: predicated region body
PF: predicated region fallthrough
CT: control target
= control target key end

     0   :  { %v372_v0 = vmov 0.0|0.0   ;;  %vm373_vm0 = vmmov 0   ;;  %v374_v8 = vmov 0.0   ;;  %vm36_vm1 = vcmask 261120   ;;  %s483_s4 = inlined_call_operand.vmem [shape: f32[32,4], index: 4, kind: input, shape index: {}]   ;;  %s484_s5 = inlined_call_operand.vmem [shape: f32[64,4], index: 5, kind: input, shape index: {}]   ;;  %s485_s3 = inlined_call_operand.vmem [shape: f32[32,4], index: 3, kind: input, shape index: {}]   ;;  %s486_s1 = inlined_call_operand.vmem [shape: f32[8,32], index: 1, kind: input, shape index: {}]   ;;  %s487_s0 = inlined_call_operand.vmem [shape: f32[8,32], index: 0, kind: input, shape index: {}]   ;;  %s488_s2 = inlined_call_operand.vmem [shape: f32[8,64], index: 2, kind: input, shape index: {}]   ;;  %s489_s6 = inlined_call_operand.vmem [shape: f32[1,4], index: 6, kind: input, shape index: {}]   ;;  %s490_s7 = inlined_call_operand.vmem [shape: f32[8,4], index: 7, kind: output, shape index: {}]  }
   0x1   :  { %345 = vmatprep.subr.bf16.mxu1 %v372_v0  ;;  %v32_v1 = vld [vmem:[%s483_s4] sm:$0xff]  ;;  %v33_v2 = vld [vmem:[%s483_s4 + $0x8] sm:$0xff]  ;;  %357 = vmatprep.subr.bf16.mxu0 %v372_v0  ;;  %v34_v6 = vld [vmem:[%s483_s4 + $0x10] sm:$0xff]  ;;  %vm192_vm2 = vcmask 523264   ;;  %vm275_vm3 = vcmask 31744  }
   0x2   :  { %v184_v3 = vld [vmem:[%s484_s5] sm:$0xff]  ;;  %v346_v4 = vpack.c.bf16 %v33_v2, %v32_v1  ;;  %v185_v5 = vld [vmem:[%s484_s5 + $0x8] sm:$0xff]  ;;  %v35_v7 = vld [vmem:[%s483_s4 + $0x18] sm:$0xff]  ;;  %312 = vmatprep.mubr.msk.f32.mxu1 %vm373_vm0, %v374_v8  ;;  %342 = vmatprep.mubr.msk.f32.mxu0 %vm373_vm0, %v374_v8 }
   0x3   :  { %v358_v9 = vpack.c.bf16 %v185_v5, %v184_v3  ;;  %v186_v10 = vld [vmem:[%s484_s5 + $0x10] sm:$0xff]  ;;  %v187_v11 = vld [vmem:[%s484_s5 + $0x18] sm:$0xff]  ;;  %v349_v12 = vpack.c.bf16 %v35_v7, %v34_v6  ;;  %v27_v14 = vld [vmem:[%s485_s3] sm:$0xff] }
   0x4   :  { %347 = vmatpush3.bf16.msra.mxu1 %v346_v4  ;;  %v361_v13 = vpack.c.bf16 %v187_v11, %v186_v10  ;;  %v28_v15 = vld [vmem:[%s485_s3 + $0x8] sm:$0xff]  ;;  %v188_v16 = vld [vmem:[%s484_s5 + $0x20] sm:$0xff]  ;;  %v29_v21 = vld [vmem:[%s485_s3 + $0x10] sm:$0xff] }
   0x5   :  { %359 = vmatpush3.bf16.msra.mxu0 %v358_v9  ;;  %348 = vmatprep.subr.bf16.mxu1 %v372_v0  ;;  %v189_v17 = vld [vmem:[%s484_s5 + $0x28] sm:$0xff]  ;;  %v31_v18 = vld [vmem:[%s486_s1] sm:$0xff]  ;;  %v352_v19 = vpack.c.bf16 %v28_v15, %v27_v14  ;;  %v30_v22 = vld [vmem:[%s485_s3 + $0x18] sm:$0xff] }
   0x6   :  { %360 = vmatprep.subr.bf16.mxu0 %v372_v0  ;;  %v364_v20 = vpack.c.bf16 %v189_v17, %v188_v16  ;;  %v190_v23 = vld [vmem:[%s484_s5 + $0x30] sm:$0xff]  ;;  %v191_v24 = vld [vmem:[%s484_s5 + $0x38] sm:$0xff]  ;;  %v355_v25 = vpack.c.bf16 %v30_v22, %v29_v21  ;;  %v26_v27 = vld [vmem:[%s487_s0] sm:$0xff] }
   0x7   :  { %v367_v26 = vpack.c.bf16 %v191_v24, %v190_v23  ;;  %v183_v28 = vld [vmem:[%s488_s2] sm:$0xff] }
   0x8   :  { %350 = vmatpush3.bf16.msra.mxu1 %v349_v12  ;;  %v284_v35 = vld [vmem:[%s489_s6] ss:$0 sm:$0xff] }
   0x9   :  { %362 = vmatpush3.bf16.msra.mxu0 %v361_v13  ;;  %351 = vmatprep.subr.bf16.mxu1 %v372_v0 }
   0xa   :  { %363 = vmatprep.subr.bf16.mxu0 %v372_v0 }
   0xb   :  { %313 = vmatmul.mubr.msk.f32.vlgmr.msra.gmra.mrb[0].mxu1 %vm36_vm1, %v31_v18 }
   0xc   :  { %353 = vmatpush3.bf16.msra.mxu1 %v352_v19  ;;  %323 = vmatprep.mubr.msk.f32.mxu1 %vm373_vm0, %v374_v8 }
   0xd   :  { %365 = vmatpush3.bf16.msra.mxu0 %v364_v20  ;;  %354 = vmatprep.subr.bf16.mxu1 %v372_v0 }
   0xe   :  { %366 = vmatprep.subr.bf16.mxu0 %v372_v0 }
  0x10   :  { %356 = vmatpush3.bf16.msra.mxu1 %v355_v25 }
  0x11   :  { %368 = vmatpush3.bf16.msra.mxu0 %v367_v26 }
  0x13   :  { %324 = vmatmul.mubr.msk.f32.vlgmr.msra.gmra.mrb[2].mxu1 %vm36_vm1, %v26_v27 }
  0x14   :  { %343 = vmatmul.mubr.msk.f32.vlgmr.msra.gmra.mrb[0].mxu0 %vm192_vm2, %v183_v28 }
  0xde   :  { %v106_v29 = vpop.f32.mrb[0].mxu1 }
  0xdf   :  { %v314_v30 = vpop.f32.mrb[1].mxu1 }
  0xe6   :  { %v179_v31 = vpop.f32.mrb[2].mxu1 }
  0xe7   :  { %v180_v32 = vadd.f32 %v179_v31, %v106_v29  ;;  %v325_v33 = vpop.f32.mrb[3].mxu1  ;;  %v262_v34 = vpop.f32.mrb[0].mxu0 }
  0xe8   :  { %v344_v36 = vpop.f32.mrb[1].mxu0 }
  0xe9   :  { %v266_v37 = vadd.f32 %v262_v34, %v180_v32 }
  0xeb   :  { %v274_v38 = vadd.f32 %v284_v35, %v266_v37 }
  0xed   :  { %276 = vst.msk [vmem:[%s490_s7] sm:$0xff] %vm275_vm3, %v274_v38 }

</bundles_post_ra>
